<compile_context>
chip_gen: v7x
topology: tpu7x:2x2x1
jax: 0.10.0
libtpu: 0.0.40
codegen_flags: <defaults>
</compile_context>

<pallas_src>
import jax
import jax.numpy as jnp
from jax.experimental import pallas as pl
from jax.experimental.pallas import tpu as pltpu


LN_EPS = 1e-5  # nn.LayerNorm default


def residual_kernel(x_ref, w_ref, b_ref, g_ref, beta_ref, o_ref):
    # x_ref:    (TM, D) row tile of the input (native dtype)
    # w_ref:    (D, D)  sublayer weight, y = x @ W (native dtype)
    # b_ref:    (1, D)  sublayer bias
    # g_ref:    (1, D)  LayerNorm gamma
    # beta_ref: (1, D)  LayerNorm beta

    # Matmul in native dtype with f32 accumulation (bf16 MXU fast path when
    # inputs are bf16).  Do NOT up-cast operands to f32 before the dot.
    sub = jnp.dot(x_ref[...], w_ref[...], preferred_element_type=jnp.float32)

    # residual add (dropout == identity in eval mode); LN statistics in f32
    y = x_ref[...].astype(jnp.float32) + sub + b_ref[...].astype(jnp.float32)

    mean = jnp.mean(y, axis=-1, keepdims=True)
    centered = y - mean
    var = jnp.mean(centered * centered, axis=-1, keepdims=True)
    normed = centered * jax.lax.rsqrt(var + LN_EPS)

    o_ref[...] = (normed * g_ref[...].astype(jnp.float32)
                  + beta_ref[...].astype(jnp.float32)).astype(o_ref.dtype)


def residual_forward(x, w, b, gamma, beta, *, tile_m=256):
    """x: [B, S, D]; w: [D, D] (y = x @ w semantics); b, gamma, beta: [D]."""
    B, S, D = x.shape
    M = B * S

    # Large row tiles amortize per-grid-step overhead; adapt down for small
    # inputs and zero-pad rows to a full tile (padded rows are LayerNorm'd
    # harmlessly and sliced off afterwards).
    tm = min(tile_m, pl.cdiv(M, 8) * 8)
    m_pad = pl.cdiv(M, tm) * tm

    x2 = x.reshape(M, D)
    if m_pad != M:
        x2 = jnp.pad(x2, ((0, m_pad - M), (0, 0)))
    b2 = b.reshape(1, D)
    g2 = gamma.reshape(1, D)
    beta2 = beta.reshape(1, D)

    grid = (m_pad // tm,)

    flops = 2 * m_pad * D * D + 10 * m_pad * D
    bytes_accessed = (2 * m_pad * D * x.dtype.itemsize      # x in + out
                      + D * D * w.dtype.itemsize            # weight
                      + 3 * D * 4)                          # bias/gamma/beta

    out = pl.pallas_call(
        residual_kernel,
        out_shape=jax.ShapeDtypeStruct((m_pad, D), x.dtype),
        grid_spec=pltpu.PrefetchScalarGridSpec(
            num_scalar_prefetch=0,
            grid=grid,
            in_specs=[
                pl.BlockSpec((tm, D), lambda i: (i, 0)),   # x rows
                # Constant-index operands: only DMA'd once (block index never
                # changes across the grid).
                # TODO(synk): for v7x-sized hidden dims (D >= 2048) tile the
                #             weight over K/N with an f32 accumulator scratch
                #             finalized via pl.when, and/or use
                #             pipeline_mode=pl.Buffered(1) to drop the second
                #             weight buffer; at small/medium D the resident
                #             whole-weight block is fastest and simplest.
                pl.BlockSpec((D, D), lambda i: (0, 0)),    # weight
                pl.BlockSpec((1, D), lambda i: (0, 0)),    # bias
                pl.BlockSpec((1, D), lambda i: (0, 0)),    # gamma
                pl.BlockSpec((1, D), lambda i: (0, 0)),    # beta
            ],
            out_specs=pl.BlockSpec((tm, D), lambda i: (i, 0)),
        ),
        compiler_params=pltpu.CompilerParams(
            dimension_semantics=("parallel",),
            vmem_limit_bytes=64 * 1024 * 1024,
        ),
        cost_estimate=pl.CostEstimate(
            flops=flops,
            transcendentals=m_pad,           # one rsqrt per row
            bytes_accessed=bytes_accessed,
        ),
    )(x2, w, b2, g2, beta2)

    if m_pad != M:
        out = out[:M]
    return out.reshape(B, S, D)


def reference_forward(x, w, b, gamma, beta):
    sub = jnp.einsum("bsd,de->bse", x, w) + b
    y = x + sub
    mean = jnp.mean(y, axis=-1, keepdims=True)
    var = jnp.mean((y - mean) ** 2, axis=-1, keepdims=True)
    return (y - mean) / jnp.sqrt(var + LN_EPS) * gamma + beta


if __name__ == "__main__":
    # Small but lane-dense shapes: batch=2, seq=8, hidden=128 (multiple of 128
    # so the output block is unmasked / lane-dense).
    B, S, D = 2, 8, 128

    key = jax.random.PRNGKey(0)
    kx, kw, kb = jax.random.split(key, 3)

    x = jax.random.normal(kx, (B, S, D), dtype=jnp.float32)

    # sublayer = nn.Linear(D, D): torch weight is [out, in]; use W.T so y = x @ w
    w_torch_style = jax.random.normal(kw, (D, D), dtype=jnp.float32) * (1.0 / jnp.sqrt(D))
    w = w_torch_style.T
    b = jax.random.normal(kb, (D,), dtype=jnp.float32) * 0.01

    # nn.LayerNorm(D) default init: gamma = 1, beta = 0
    gamma = jnp.ones((D,), dtype=jnp.float32)
    beta = jnp.zeros((D,), dtype=jnp.float32)

    out = residual_forward(x, w, b, gamma, beta)
    out = jax.block_until_ready(out)

    ref = reference_forward(x, w, b, gamma, beta)
    assert out.shape == (B, S, D)
    # Tolerance allows for TPU default (multi-pass bf16) f32 matmul precision
    # on both the kernel and the XLA reference path.
    assert jnp.allclose(out, ref, atol=1e-3, rtol=1e-3), "mismatch vs reference"

    print("KERNEL_OK")
</pallas_src>

<mosaic_0001>
module attributes {stable_mosaic.version = 11 : i64} {
  func.func @residual_kernel(%arg0: i32, %arg1: memref<16x128xf32, #tpu.memory_space<vmem>>, %arg2: memref<128x128xf32, #tpu.memory_space<vmem>>, %arg3: memref<1x128xf32, #tpu.memory_space<vmem>>, %arg4: memref<1x128xf32, #tpu.memory_space<vmem>>, %arg5: memref<1x128xf32, #tpu.memory_space<vmem>>, %arg6: memref<16x128xf32, #tpu.memory_space<vmem>>) attributes {dimension_semantics = [#tpu.dimension_semantics<parallel>], iteration_bounds = array<i64: 1>, scalar_prefetch = 0 : i64, scratch_operands = 0 : i64, tpu.core_type = #tpu.core_type<tc>, window_params = [{transform_indices = @transform_0, window_bounds = array<i64: 16, 128>}, {pipeline_mode = #tpu.pipeline_mode<synchronous>, transform_indices = @transform_1, window_bounds = array<i64: 128, 128>}, {pipeline_mode = #tpu.pipeline_mode<synchronous>, transform_indices = @transform_2, window_bounds = array<i64: 1, 128>}, {pipeline_mode = #tpu.pipeline_mode<synchronous>, transform_indices = @transform_3, window_bounds = array<i64: 1, 128>}, {pipeline_mode = #tpu.pipeline_mode<synchronous>, transform_indices = @transform_4, window_bounds = array<i64: 1, 128>}, {transform_indices = @transform_5, window_bounds = array<i64: 16, 128>}]} {
    %c0 = arith.constant 0 : index
    %c0_0 = arith.constant 0 : index
    %0 = vector.load %arg1[%c0, %c0_0] : memref<16x128xf32, #tpu.memory_space<vmem>>, vector<16x128xf32>
    %c0_1 = arith.constant 0 : index
    %c0_2 = arith.constant 0 : index
    %1 = vector.load %arg2[%c0_1, %c0_2] : memref<128x128xf32, #tpu.memory_space<vmem>>, vector<128x128xf32>
    %cst = arith.constant dense<0.000000e+00> : vector<16x128xf32>
    %2 = tpu.matmul %0, %1, %cst {dimension_numbers = #tpu.dot_dimension_numbers<[1], [0], [0], [1], [0, 0, 1, 1], [], []>} : vector<16x128xf32>, vector<128x128xf32>, vector<16x128xf32> -> vector<16x128xf32>
    %c0_3 = arith.constant 0 : index
    %c0_4 = arith.constant 0 : index
    %3 = vector.load %arg1[%c0_3, %c0_4] : memref<16x128xf32, #tpu.memory_space<vmem>>, vector<16x128xf32>
    %4 = arith.addf %3, %2 : vector<16x128xf32>
    %c0_5 = arith.constant 0 : index
    %c0_6 = arith.constant 0 : index
    %5 = vector.load %arg3[%c0_5, %c0_6] : memref<1x128xf32, #tpu.memory_space<vmem>>, vector<1x128xf32>
    %6 = vector.broadcast %5 : vector<1x128xf32> to vector<16x128xf32>
    %7 = arith.addf %4, %6 : vector<16x128xf32>
    %cst_7 = arith.constant dense<0.000000e+00> : vector<16xf32>
    %8 = vector.multi_reduction <add>, %7, %cst_7 [1] : vector<16x128xf32> to vector<16xf32>
    %9 = vector.shape_cast %8 : vector<16xf32> to vector<16x1xf32>
    %cst_8 = arith.constant 1.280000e+02 : f32
    %10 = vector.broadcast %cst_8 : f32 to vector<16x1xf32>
    %11 = arith.divf %9, %10 : vector<16x1xf32>
    %12 = vector.broadcast %11 : vector<16x1xf32> to vector<16x128xf32>
    %13 = arith.subf %7, %12 : vector<16x128xf32>
    %14 = arith.mulf %13, %13 : vector<16x128xf32>
    %cst_9 = arith.constant dense<0.000000e+00> : vector<16xf32>
    %15 = vector.multi_reduction <add>, %14, %cst_9 [1] : vector<16x128xf32> to vector<16xf32>
    %16 = vector.shape_cast %15 : vector<16xf32> to vector<16x1xf32>
    %cst_10 = arith.constant 1.280000e+02 : f32
    %17 = vector.broadcast %cst_10 : f32 to vector<16x1xf32>
    %18 = arith.divf %16, %17 : vector<16x1xf32>
    %cst_11 = arith.constant 9.99999974E-6 : f32
    %19 = vector.broadcast %cst_11 : f32 to vector<16x1xf32>
    %20 = arith.addf %18, %19 : vector<16x1xf32>
    %21 = math.rsqrt %20 : vector<16x1xf32>
    %22 = vector.broadcast %21 : vector<16x1xf32> to vector<16x128xf32>
    %23 = arith.mulf %13, %22 : vector<16x128xf32>
    %c0_12 = arith.constant 0 : index
    %c0_13 = arith.constant 0 : index
    %24 = vector.load %arg4[%c0_12, %c0_13] : memref<1x128xf32, #tpu.memory_space<vmem>>, vector<1x128xf32>
    %25 = vector.broadcast %24 : vector<1x128xf32> to vector<16x128xf32>
    %26 = arith.mulf %23, %25 : vector<16x128xf32>
    %c0_14 = arith.constant 0 : index
    %c0_15 = arith.constant 0 : index
    %27 = vector.load %arg5[%c0_14, %c0_15] : memref<1x128xf32, #tpu.memory_space<vmem>>, vector<1x128xf32>
    %28 = vector.broadcast %27 : vector<1x128xf32> to vector<16x128xf32>
    %29 = arith.addf %26, %28 : vector<16x128xf32>
    %c0_16 = arith.constant 0 : index
    %c0_17 = arith.constant 0 : index
    %30 = vector.load %arg6[%c0_16, %c0_17] : memref<16x128xf32, #tpu.memory_space<vmem>>, vector<16x128xf32>
    tpu.vector_store %arg6[%c0_16, %c0_17], %29 {strides = array<i32>} : memref<16x128xf32, #tpu.memory_space<vmem>>, vector<16x128xf32>,
    return
  }
  func.func @transform_0(%arg0: i32) -> (i32, i32) {
    %c0_i32 = arith.constant 0 : i32
    %c0_i32_0 = arith.constant 0 : i32
    return %arg0, %c0_i32 : i32, i32
  }
  func.func @transform_1(%arg0: i32) -> (i32, i32) {
    %c0_i32 = arith.constant 0 : i32
    %c0_i32_0 = arith.constant 0 : i32
    %c0_i32_1 = arith.constant 0 : i32
    return %c0_i32, %c0_i32_0 : i32, i32
  }
  func.func @transform_2(%arg0: i32) -> (i32, i32) {
    %c0_i32 = arith.constant 0 : i32
    %c0_i32_0 = arith.constant 0 : i32
    %c0_i32_1 = arith.constant 0 : i32
    return %c0_i32, %c0_i32_0 : i32, i32
  }
  func.func @transform_3(%arg0: i32) -> (i32, i32) {
    %c0_i32 = arith.constant 0 : i32
    %c0_i32_0 = arith.constant 0 : i32
    %c0_i32_1 = arith.constant 0 : i32
    return %c0_i32, %c0_i32_0 : i32, i32
  }
  func.func @transform_4(%arg0: i32) -> (i32, i32) {
    %c0_i32 = arith.constant 0 : i32
    %c0_i32_0 = arith.constant 0 : i32
    %c0_i32_1 = arith.constant 0 : i32
    return %c0_i32, %c0_i32_0 : i32, i32
  }
  func.func @transform_5(%arg0: i32) -> (i32, i32) {
    %c0_i32 = arith.constant 0 : i32
    %c0_i32_0 = arith.constant 0 : i32
    return %arg0, %c0_i32 : i32, i32
  }
}

</mosaic_0001>

<bundles_post_ra>
// kernel: tpu_custom_call.1
= control target key start
LH: loop header
LB: loop body
LE: loop exit
PB: predicated region body
PF: predicated region fallthrough
CT: control target
= control target key end

     0   :  { %10 = vsyncpa [#allocation3], 0  ;;  %s616_s0 = inlined_call_operand.hbm [shape: f32[16,128], index: 0, kind: input, shape index: {}]   ;;  %s617_s1 = inlined_call_operand.hbm [shape: f32[128,128], index: 1, kind: input, shape index: {}]   ;;  %s618_s2 = inlined_call_operand.hbm [shape: f32[1,128], index: 2, kind: input, shape index: {}]   ;;  %s619_s3 = inlined_call_operand.hbm [shape: f32[1,128], index: 3, kind: input, shape index: {}]   ;;  %s620_s4 = inlined_call_operand.hbm [shape: f32[1,128], index: 4, kind: input, shape index: {}]   ;;  %s621_s5 = inlined_call_operand.hbm [shape: f32[16,128], index: 5, kind: output, shape index: {}]  }
   0x1   :  { %11 = vsyncpa [#allocation6], 0 }
   0x2   :  { %12 = vsyncpa [#allocation9], 0 }
   0x3   :  { %13 = vsyncpa [#allocation4], 0  ;;  %s489_s18 = smov [#allocation5]   ;;  %s490_s20 = smov [#allocation8]  }
   0x4   :  { %s31_s19 = sshll.u32 %s489_s18, 4  ;;  %s54_s21 = sshll.u32 %s490_s20, 4  ;;  %s32_s19 = int_to_ptr.vmem [resolvable:$true] %s31_s19  ;;  %s527_s21 = int_to_ptr.vmem [resolvable:$true] %s54_s21 }
   0x5   :  { %s349_s24 = scalar_lea.hbm %s617_s1, 2048 }
   0x6   :  { %p350_p0 = scmp.ne.s32.totalorder %s617_s1, %s349_s24  ;;  %p353_p1 = scmp.lt.u32.totalorder %s349_s24, %s617_s1 }
   0x8   :  { %p355_p2 = pnand %p353_p1, %p350_p0 }
   0xa   :  { %358 = shalt.err (!%p355_p2)
}
   0xb   :  { %s359_s29 = scalar_lea.vmem %s32_s19, 2048  ;;  %p364_p4 = scmp.lt.s32.totalorder %s32_s19, %s32_s19 }
   0xc   :  { %p360_p3 = scmp.ne.s32.totalorder %s32_s19, %s359_s29  ;;  %p365_p5 = scmp.lt.s32.totalorder %s359_s29, %s359_s29 }
   0xe   :  { %p366_p6 = por %p365_p5, %p364_p4 }
  0x10   :  { %p367_p7 = pnand %p366_p6, %p360_p3 }
  0x12   :  { %370 = shalt.err (!%p367_p7)
}
  0x13   :  { %s491_s30 = smov 128   ;;  %s492_s6 = smov 8  }
  0x14   :  { %37 = dma.hbm_to_vmem [thread:$0]  %s617_s1, 2048, %s32_s19, [#allocation6], %s491_s30, %s491_s30, %s492_s6  }
  0x15   :  { %s371_s11 = scalar_lea.hbm %s619_s3, 16 }
  0x16   :  { %p372_p8 = scmp.ne.s32.totalorder %s619_s3, %s371_s11  ;;  %p375_p9 = scmp.lt.u32.totalorder %s371_s11, %s619_s3 }
  0x18   :  { %p377_p10 = pnand %p375_p9, %p372_p8 }
  0x1a   :  { %380 = shalt.err (!%p377_p10)
}
  0x1b   :  { %s381_s16 = scalar_lea.vmem %s527_s21, 16  ;;  %s385_s1 = scalar_lea.vmem %s527_s21, 32 }
  0x1c   :  { %p382_p11 = scmp.ne.s32.totalorder %s527_s21, %s381_s16  ;;  %p386_p12 = scmp.lt.s32.totalorder %s527_s21, %s527_s21 }
  0x1d   :  { %p387_p13 = scmp.lt.s32.totalorder %s385_s1, %s381_s16 }
  0x1f   :  { %p388_p0 = por %p387_p13, %p386_p12 }
  0x21   :  { %p389_p1 = pnand %p388_p0, %p382_p11 }
  0x23   :  { %392 = shalt.err (!%p389_p1)
}
  0x24   :  { %57 = dma.hbm_to_vmem [thread:$0]  %s619_s3, 16, %s527_s21, [#allocation9]  }
  0x25   :  { %s493_s19 = smov [#allocation2]   ;;  %s494_s22 = smov [#allocation7]  }
  0x26   :  { %s19_s20 = sshll.u32 %s493_s19, 4  ;;  %s44_s23 = sshll.u32 %s494_s22, 4  ;;  %s20_s20 = int_to_ptr.vmem [resolvable:$true] %s19_s20  ;;  %s45_s23 = int_to_ptr.vmem [resolvable:$true] %s44_s23 }
  0x27   :  { %s393_s26 = scalar_lea.hbm %s616_s0, 256 }
  0x28   :  { %p394_p2 = scmp.ne.s32.totalorder %s616_s0, %s393_s26  ;;  %p397_p3 = scmp.lt.u32.totalorder %s393_s26, %s616_s0 }
  0x2a   :  { %p399_p4 = pnand %p397_p3, %p394_p2 }
  0x2c   :  { %402 = shalt.err (!%p399_p4)
}
  0x2d   :  { %s403_s3 = scalar_lea.vmem %s20_s20, 256  ;;  %p408_p6 = scmp.lt.s32.totalorder %s20_s20, %s20_s20 }
  0x2e   :  { %p404_p5 = scmp.ne.s32.totalorder %s20_s20, %s403_s3  ;;  %p409_p7 = scmp.lt.s32.totalorder %s403_s3, %s403_s3 }
  0x30   :  { %p410_p8 = por %p409_p7, %p408_p6 }
  0x32   :  { %p411_p9 = pnand %p410_p8, %p404_p5 }
  0x34   :  { %414 = shalt.err (!%p411_p9)
}
  0x35   :  { %25 = dma.hbm_to_vmem [thread:$0]  %s616_s0, 256, %s20_s20, [#allocation3], %s491_s30, %s491_s30, %s492_s6  }
  0x36   :  { %s415_s11 = scalar_lea.hbm %s618_s2, 16 }
  0x37   :  { %p416_p10 = scmp.ne.s32.totalorder %s618_s2, %s415_s11  ;;  %p419_p11 = scmp.lt.u32.totalorder %s415_s11, %s618_s2 }
  0x39   :  { %p421_p12 = pnand %p419_p11, %p416_p10 }
  0x3b   :  { %424 = shalt.err (!%p421_p12)
}
  0x3c   :  { %s425_s16 = scalar_lea.vmem %s45_s23, 16  ;;  %s429_s1 = scalar_lea.vmem %s45_s23, 32 }
  0x3d   :  { %p426_p13 = scmp.ne.s32.totalorder %s45_s23, %s425_s16  ;;  %p430_p0 = scmp.lt.s32.totalorder %s45_s23, %s45_s23 }
  0x3e   :  { %p431_p1 = scmp.lt.s32.totalorder %s429_s1, %s425_s16 }
  0x40   :  { %p432_p2 = por %p431_p1, %p430_p0 }
  0x42   :  { %p433_p3 = pnand %p432_p2, %p426_p13 }
  0x44   :  { %436 = shalt.err (!%p433_p3)
}
  0x45   :  { %47 = dma.hbm_to_vmem [thread:$0]  %s618_s2, 16, %s45_s23, [#allocation6]  }
  0x46   :  { %s495_s18 = smov [#allocation10]   ;;  %s437_s24 = scalar_lea.hbm %s620_s4, 16 }
  0x47   :  { %s64_s19 = sshll.u32 %s495_s18, 4  ;;  %p438_p4 = scmp.ne.s32.totalorder %s620_s4, %s437_s24  ;;  %s65_s19 = int_to_ptr.vmem [resolvable:$true] %s64_s19 }
  0x48   :  { %p441_p5 = scmp.lt.u32.totalorder %s437_s24, %s620_s4 }
  0x4a   :  { %p443_p6 = pnand %p441_p5, %p438_p4 }
  0x4c   :  { %446 = shalt.err (!%p443_p6)
}
  0x4d   :  { %s447_s29 = scalar_lea.vmem %s65_s19, 16  ;;  %s451_s2 = scalar_lea.vmem %s65_s19, 32 }
  0x4e   :  { %p448_p7 = scmp.ne.s32.totalorder %s65_s19, %s447_s29  ;;  %p452_p8 = scmp.lt.s32.totalorder %s65_s19, %s65_s19 }
  0x4f   :  { %p453_p9 = scmp.lt.s32.totalorder %s451_s2, %s447_s29 }
  0x51   :  { %p454_p10 = por %p453_p9, %p452_p8 }
  0x53   :  { %p455_p11 = pnand %p454_p10, %p448_p7 }
  0x55   :  { %458 = shalt.err (!%p455_p11)
}
  0x56   :  { %67 = dma.hbm_to_vmem [thread:$0]  %s620_s4, 16, %s65_s19, [#allocation9]  }
  0x57   :  { %481 = dma.done.wait [#allocation3], 256  }
  0x58   :  { %482 = vsyncadd [#allocation3], 4294967040 }
  0x59   :  { %483 = dma.done.wait [#allocation6], 2064  }
  0x5a   :  { %484 = vsyncadd [#allocation6], 4294965232 }
  0x5b   :  { %485 = dma.done.wait [#allocation9], 32  }
  0x5c   :  { %486 = vsyncadd [#allocation9], 4294967264  ;;  %v85_v0 = vld [vmem:[#allocation5] sm:$0xff]  ;;  %v86_v1 = vld [vmem:[#allocation5 + $0x8] sm:$0xff]  ;;  %s496_s4 = smov [#allocation11]  }
  0x5d   :  { %v87_v2 = vld [vmem:[#allocation5 + $0x10] sm:$0xff]  ;;  %v305_v3 = vpack.c.bf16 %v86_v1, %v85_v0  ;;  %v88_v4 = vld [vmem:[#allocation5 + $0x18] sm:$0xff]  ;;  %v89_v6 = vld [vmem:[#allocation5 + $0x20] sm:$0xff]  ;;  %s235_s3 = sshll.u32 %s496_s4, 4  ;;  %s236_s3 = int_to_ptr.vmem [resolvable:$true] %s235_s3 }
  0x5e   :  { %v309_v5 = vpack.c.bf16 %v88_v4, %v87_v2  ;;  %v90_v7 = vld [vmem:[#allocation5 + $0x28] sm:$0xff]  ;;  %v83_v9 = vld [vmem:[#allocation2] sm:$0xff]  ;;  %v92_v11 = vld [vmem:[#allocation5 + $0x38] sm:$0xff]  ;;  %s459_s21 = scalar_lea.vmem %s236_s3, 256  ;;  %p464_p13 = scmp.lt.s32.totalorder %s236_s3, %s236_s3 }
  0x5f   :  { %306 = vmatprep.subr.bf16.mxu0 %v305_v3  ;;  %v313_v8 = vpack.c.bf16 %v90_v7, %v89_v6  ;;  %v91_v10 = vld [vmem:[#allocation5 + $0x30] sm:$0xff]  ;;  %302 = vmatprep.mubr.f32.mxu0 %v83_v9  ;;  %v93_v13 = vld [vmem:[#allocation5 + $0x40] sm:$0xff]  ;;  %v94_v14 = vld [vmem:[#allocation5 + $0x48] sm:$0xff]  ;;  %p460_p12 = scmp.ne.s32.totalorder %s236_s3, %s459_s21  ;;  %p465_p0 = scmp.lt.s32.totalorder %s459_s21, %s459_s21 }
  0x60   :  { %308 = vmatpush3.bf16.msra.mxu0 %v305_v3  ;;  %v317_v12 = vpack.c.bf16 %v92_v11, %v91_v10  ;;  %v321_v15 = vpack.c.bf16 %v94_v14, %v93_v13  ;;  %v95_v16 = vld [vmem:[#allocation5 + $0x50] sm:$0xff]  ;;  %v96_v17 = vld [vmem:[#allocation5 + $0x58] sm:$0xff]  ;;  %v97_v19 = vld [vmem:[#allocation5 + $0x60] sm:$0xff] }
  0x61   :  { %310 = vmatprep.subr.bf16.mxu0 %v309_v5  ;;  %v325_v18 = vpack.c.bf16 %v96_v17, %v95_v16  ;;  %v98_v20 = vld [vmem:[#allocation5 + $0x68] sm:$0xff]  ;;  %v99_v22 = vld [vmem:[#allocation5 + $0x70] sm:$0xff]  ;;  %v100_v23 = vld [vmem:[#allocation5 + $0x78] sm:$0xff]  ;;  %p466_p1 = por %p465_p0, %p464_p13 }
  0x62   :  { %v329_v21 = vpack.c.bf16 %v98_v20, %v97_v19  ;;  %v333_v24 = vpack.c.bf16 %v100_v23, %v99_v22  ;;  %v84_v25 = vld [vmem:[#allocation2 + $0x8] sm:$0xff]  ;;  %v249_v28 = vld [vmem:[#allocation7] ss:$0 sm:$0xff]  ;;  %v250_v48 = vld [vmem:[#allocation8] ss:$0 sm:$0xff] }
  0x63   :  { %v251_v50 = vld [vmem:[#allocation10] ss:$0 sm:$0xff]  ;;  %p467_p2 = pnand %p466_p1, %p460_p12 }
  0x64   :  { %312 = vmatpush3.bf16.msra.mxu0 %v309_v5 }
  0x65   :  { %314 = vmatprep.subr.bf16.mxu0 %v313_v8 }
  0x68   :  { %316 = vmatpush3.bf16.msra.mxu0 %v313_v8 }
  0x69   :  { %318 = vmatprep.subr.bf16.mxu0 %v317_v12 }
  0x6c   :  { %320 = vmatpush3.bf16.msra.mxu0 %v317_v12 }
  0x6d   :  { %322 = vmatprep.subr.bf16.mxu0 %v321_v15 }
  0x70   :  { %324 = vmatpush3.bf16.msra.mxu0 %v321_v15 }
  0x71   :  { %326 = vmatprep.subr.bf16.mxu0 %v325_v18 }
  0x74   :  { %328 = vmatpush3.bf16.msra.mxu0 %v325_v18 }
  0x75   :  { %330 = vmatprep.subr.bf16.mxu0 %v329_v21 }
  0x78   :  { %332 = vmatpush3.bf16.msra.mxu0 %v329_v21 }
  0x79   :  { %334 = vmatprep.subr.bf16.mxu0 %v333_v24 }
  0x7c   :  { %336 = vmatpush3.bf16.msra.mxu0 %v333_v24 }
  0x7f   :  { %303 = vmatmul.mubr.f32.vlgmr.msra.gmra.mrb[0].mxu0 %v84_v25 }
 0x152   :  { %v304_v26 = vpop.f32.mrb[0].mxu0 }
 0x153   :  { %v167_v27 = vpop.f32.mrb[1].mxu0  ;;  %v177_v30 = vadd.f32 %v304_v26, %v84_v25 }
 0x154   :  { %v176_v29 = vadd.f32 %v167_v27, %v83_v9 }
 0x155   :  { %v186_v32 = vadd.f32 %v249_v28, %v177_v30 }
 0x156   :  { %v185_v31 = vadd.f32 %v249_v28, %v176_v29 }
 0x158   :  { %187 = vadd.xlane.f32.xlu0 %v185_v31 }
 0x15c   :  { %189 = vadd.xlane.f32.xlu0 %v186_v32 }
 0x1e5   :  { %v188_v33 = vpop.xlane.xlu0 %187 }
 0x1e6   :  { %v192_v34 = vmul.f32 0.0078125, %v188_v33 }
 0x1e8   :  { %v194_v35 = vsub.f32 %v185_v31, %v192_v34 }
 0x1e9   :  { %v190_v36 = vpop.xlane.xlu0 %189 }
 0x1ea   :  { %v193_v37 = vmul.f32 0.0078125, %v190_v36  ;;  %v196_v38 = vmul.f32 %v194_v35, %v194_v35 }
 0x1ec   :  { %v195_v39 = vsub.f32 %v186_v32, %v193_v37  ;;  %198 = vadd.xlane.f32.xlu1 %v196_v38 }
 0x1ee   :  { %v197_v40 = vmul.f32 %v195_v39, %v195_v39 }
 0x1f0   :  { %200 = vadd.xlane.f32.xlu1 %v197_v40 }
 0x279   :  { %v199_v41 = vpop.xlane.xlu1 %198 }
 0x27a   :  { %v202_v42 = vmul.f32 0.0078125, %v199_v41 }
 0x27c   :  { %v204_v43 = vadd.f32 1e-05, %v202_v42 }
 0x27d   :  { %v201_v44 = vpop.xlane.xlu1 %200 }
 0x27e   :  { %345 = vrsqrt.f32 %v204_v43  ;;  %v203_v45 = vmul.f32 0.0078125, %v201_v44 }
 0x280   :  { %v205_v46 = vadd.f32 1e-05, %v203_v45 }
 0x282   :  { %347 = vrsqrt.f32 %v205_v46 }
 0x288   :  { %v346_v47 = vpop.eup %345 }
 0x289   :  { %v208_v49 = vmul.f32 %v346_v47, %v194_v35 }
 0x28b   :  { %v217_v51 = vmul.f32 %v250_v48, %v208_v49 }
 0x28c   :  { %v348_v52 = vpop.eup %347 }
 0x28d   :  { %v209_v53 = vmul.f32 %v348_v52, %v195_v39  ;;  %v226_v54 = vadd.f32 %v251_v50, %v217_v51 }
 0x28f   :  { %v218_v55 = vmul.f32 %v250_v48, %v209_v53  ;;  %228 = vst [vmem:[#allocation11] sm:$0xff] %v226_v54 }
 0x291   :  { %v227_v56 = vadd.f32 %v251_v50, %v218_v55 }
 0x293   :  { %229 = vst [vmem:[#allocation11 + $0x8] sm:$0xff] %v227_v56 }
 0x294   :  { %470 = shalt.err (!%p467_p2)
}
 0x295   :  { %s471_s10 = scalar_lea.hbm %s621_s5, 256 }
 0x296   :  { %p472_p3 = scmp.ne.s32.totalorder %s621_s5, %s471_s10  ;;  %p475_p4 = scmp.lt.u32.totalorder %s471_s10, %s621_s5 }
 0x298   :  { %p477_p5 = pnand %p475_p4, %p472_p3 }
 0x29a   :  { %480 = shalt.err (!%p477_p5)
}
 0x29b   :  { %241 = dma.vmem_to_hbm [thread:$0]  %s236_s3, 256, %s621_s5, [#allocation4], %s491_s30, %s491_s30, %s492_s6  }
 0x29c   :  { %487 = dma.done.wait [#allocation4], 256  }
 0x29d   :  { %488 = vsyncadd [#allocation4], 4294967040 }
 0x29e   :  { %245 = vsyncpa [#allocation3], 1 }
 0x29f   :  { %246 = vsyncpa [#allocation6], 1 }
 0x2a0   :  { %247 = vsyncpa [#allocation9], 1 }
 0x2a1   :  { %248 = vsyncpa [#allocation4], 1 }

</bundles_post_ra>
